<compile_context>
chip_gen: v6e
topology: v6e:2x2x1
jax: 0.10.0
libtpu: 0.0.40
codegen_flags: <defaults>
</compile_context>

<pallas_src>
import jax
import jax.numpy as jnp
from jax.experimental import pallas as pl
from jax.experimental.pallas import tpu as pltpu


def _round_up(n: int, m: int) -> int:
    return ((n + m - 1) // m) * m


def titanic_kernel(x_ref, w1_ref, w2_ref, w3t_ref, bias_ref, o_ref):
    """One batch-tile of the fused forward pass.

    x_ref   : (TILE_B, F)     f32   batch tile
    w1_ref  : (F, 64)         f32
    w2_ref  : (64, 32)        f32
    w3t_ref : (8, 32)         f32   fc3 weight transposed, sublane-padded (row 0 valid)
    bias_ref: (3, 128)        f32   row0 = b1[:64], row1 = b2[:32], row2 = b3[:1]
    o_ref   : (1, 1, TILE_B)  f32   lane-dense sigmoid output
    """
    x = x_ref[...]

    b1 = bias_ref[0:1, 0:64]   # (1, 64)
    b2 = bias_ref[1:2, 0:32]   # (1, 32)
    b3 = bias_ref[2:3, 0:1]    # (1, 1)

    # fc1 + relu
    h1 = jnp.dot(x, w1_ref[...], preferred_element_type=jnp.float32) + b1
    h1 = jnp.maximum(h1, 0.0)

    # dropout: identity (inference semantics)

    # fc2 + relu
    h2 = jnp.dot(h1, w2_ref[...], preferred_element_type=jnp.float32) + b2
    h2 = jnp.maximum(h2, 0.0)

    # fc3 computed transposed so the result is lane-dense along the batch:
    #   full[r, b] = sum_k w3t[r, k] * h2[b, k];  row 0 holds the real logits.
    full = jax.lax.dot_general(
        w3t_ref[...], h2,
        dimension_numbers=(((1,), (1,)), ((), ())),
        preferred_element_type=jnp.float32)            # (8, TILE_B)
    logits = full[0:1, :] + b3                         # (1, TILE_B)

    # sigmoid with EUP-friendly approximate reciprocal
    o_ref[0] = pl.reciprocal(1.0 + jnp.exp(-logits), approx=True)


def titanic_net(x, params, *, tile_b: int = 1024):
    """Forward pass of TitanicNet. x: (B, F) f32. Returns (B, 1) f32 in [0, 1]."""
    w1, b1, w2, b2, w3, b3 = params
    B, F = x.shape

    # Batch tile: multiple of 8 sublanes, capped at tile_b. 1024-row tiles are
    # a lane-dense multiple of 128 for the output and tiny vs. VMEM everywhere.
    tb = min(tile_b, _round_up(B, 8))
    b_pad = _round_up(B, tb)
    num_tiles = b_pad // tb
    if b_pad != B:
        x = jnp.pad(x, ((0, b_pad - B), (0, 0)))

    # Consolidate the three tiny biases into a single (3, 128) operand so the
    # kernel has one bias DMA instead of three padded-out tiles.
    bias = jnp.zeros((3, 128), jnp.float32)
    bias = bias.at[0, :64].set(b1.reshape(-1))
    bias = bias.at[1, :32].set(b2.reshape(-1))
    bias = bias.at[2, :1].set(b3.reshape(-1))

    # fc3 weight, transposed and padded to 8 sublanes (rows 1..7 are zero).
    w3t = jnp.zeros((8, 32), jnp.float32).at[0, :].set(w3.reshape(-1))

    out = pl.pallas_call(
        titanic_kernel,
        out_shape=jax.ShapeDtypeStruct((num_tiles, 1, tb), jnp.float32),
        grid=(num_tiles,),
        in_specs=[
            pl.BlockSpec((tb, F), lambda i: (i, 0)),       # x: tiled over batch
            pl.BlockSpec(w1.shape, lambda i: (0, 0)),      # weights pinned in VMEM
            pl.BlockSpec(w2.shape, lambda i: (0, 0)),
            pl.BlockSpec((8, 32), lambda i: (0, 0)),
            pl.BlockSpec((3, 128), lambda i: (0, 0)),
        ],
        out_specs=pl.BlockSpec((1, 1, tb), lambda i: (i, 0, 0)),
        compiler_params=pltpu.CompilerParams(
            dimension_semantics=("parallel",)),            # 2nd TC on v7x
    )(x, w1, w2, w3t, bias)

    # (num_tiles, 1, tb) -> (B, 1)
    return out.reshape(b_pad, 1)[:B]


def titanic_net_reference(x, params):
    """Pure-JAX reference for correctness checking."""
    w1, b1, w2, b2, w3, b3 = params
    h1 = jnp.maximum(x @ w1 + b1, 0.0)
    h2 = jnp.maximum(h1 @ w2 + b2, 0.0)
    return jax.nn.sigmoid(h2 @ w3 + b3)


def init_params(key, input_size):
    """Deterministic init mimicking PyTorch nn.Linear default (U[-1/sqrt(fan_in), +])."""
    ks = jax.random.split(key, 6)

    def linear(kw, kb, fan_in, fan_out):
        bound = 1.0 / jnp.sqrt(jnp.float32(fan_in))
        w = jax.random.uniform(kw, (fan_in, fan_out), jnp.float32, -bound, bound)
        b = jax.random.uniform(kb, (fan_out,), jnp.float32, -bound, bound)
        return w, b

    w1, b1 = linear(ks[0], ks[1], input_size, 64)
    w2, b2 = linear(ks[2], ks[3], 64, 32)
    w3, b3 = linear(ks[4], ks[5], 32, 1)
    return (w1, b1, w2, b2, w3, b3)


if __name__ == "__main__":
    key = jax.random.PRNGKey(0)
    k_params, k_x = jax.random.split(key)

    input_size = 8   # typical Titanic feature count
    batch = 20       # not a multiple of the tile -> exercises padding + slicing

    params = init_params(k_params, input_size)
    x = jax.random.normal(k_x, (batch, input_size), dtype=jnp.float32)

    # Small tile so the demo exercises the multi-step (grid > 1) pipelined path.
    out = jax.block_until_ready(titanic_net(x, params, tile_b=8))
    ref = titanic_net_reference(x, params)

    assert out.shape == (batch, 1), out.shape
    assert bool(jnp.all(jnp.isfinite(out)))
    # approximate reciprocal in the sigmoid -> modest tolerance vs. exact ref
    assert bool(jnp.allclose(out, ref, atol=2e-2, rtol=2e-2)), (
        float(jnp.max(jnp.abs(out - ref))))
    print("KERNEL_OK")
</pallas_src>

<mosaic_0001>
module attributes {stable_mosaic.version = 11 : i64} {
  func.func @titanic_kernel(%arg0: i32, %arg1: memref<8x8xf32, #tpu.memory_space<vmem>>, %arg2: memref<8x64xf32, #tpu.memory_space<vmem>>, %arg3: memref<64x32xf32, #tpu.memory_space<vmem>>, %arg4: memref<8x32xf32, #tpu.memory_space<vmem>>, %arg5: memref<3x128xf32, #tpu.memory_space<vmem>>, %arg6: memref<1x1x8xf32, #tpu.memory_space<vmem>>) attributes {dimension_semantics = [#tpu.dimension_semantics<parallel>], iteration_bounds = array<i64: 3>, scalar_prefetch = 0 : i64, scratch_operands = 0 : i64, tpu.core_type = #tpu.core_type<tc>, window_params = [{transform_indices = @transform_0, window_bounds = array<i64: 8, 8>}, {pipeline_mode = #tpu.pipeline_mode<synchronous>, transform_indices = @transform_1, window_bounds = array<i64: 8, 64>}, {pipeline_mode = #tpu.pipeline_mode<synchronous>, transform_indices = @transform_2, window_bounds = array<i64: 64, 32>}, {pipeline_mode = #tpu.pipeline_mode<synchronous>, transform_indices = @transform_3, window_bounds = array<i64: 8, 32>}, {pipeline_mode = #tpu.pipeline_mode<synchronous>, transform_indices = @transform_4, window_bounds = array<i64: 3, 128>}, {transform_indices = @transform_5, window_bounds = array<i64: 1, 1, 8>}]} {
    %c0 = arith.constant 0 : index
    %c0_0 = arith.constant 0 : index
    %0 = vector.load %arg1[%c0, %c0_0] : memref<8x8xf32, #tpu.memory_space<vmem>>, vector<8x8xf32>
    %c0_1 = arith.constant 0 : index
    %c0_2 = arith.constant 0 : index
    %1 = vector.load %arg5[%c0_1, %c0_2] : memref<3x128xf32, #tpu.memory_space<vmem>>, vector<1x64xf32>
    %c1 = arith.constant 1 : index
    %c0_3 = arith.constant 0 : index
    %2 = vector.load %arg5[%c1, %c0_3] : memref<3x128xf32, #tpu.memory_space<vmem>>, vector<1x32xf32>
    %c2 = arith.constant 2 : index
    %c0_4 = arith.constant 0 : index
    %3 = vector.load %arg5[%c2, %c0_4] : memref<3x128xf32, #tpu.memory_space<vmem>>, vector<1x1xf32>
    %c0_5 = arith.constant 0 : index
    %c0_6 = arith.constant 0 : index
    %4 = vector.load %arg2[%c0_5, %c0_6] : memref<8x64xf32, #tpu.memory_space<vmem>>, vector<8x64xf32>
    %cst = arith.constant dense<0.000000e+00> : vector<8x64xf32>
    %5 = tpu.matmul %0, %4, %cst {dimension_numbers = #tpu.dot_dimension_numbers<[1], [0], [0], [1], [0, 0, 1, 1], [], []>} : vector<8x8xf32>, vector<8x64xf32>, vector<8x64xf32> -> vector<8x64xf32>
    %6 = vector.broadcast %1 : vector<1x64xf32> to vector<8x64xf32>
    %7 = arith.addf %5, %6 : vector<8x64xf32>
    %cst_7 = arith.constant 0.000000e+00 : f32
    %8 = vector.broadcast %cst_7 : f32 to vector<8x64xf32>
    %9 = arith.maximumf %7, %8 : vector<8x64xf32>
    %c0_8 = arith.constant 0 : index
    %c0_9 = arith.constant 0 : index
    %10 = vector.load %arg3[%c0_8, %c0_9] : memref<64x32xf32, #tpu.memory_space<vmem>>, vector<64x32xf32>
    %cst_10 = arith.constant dense<0.000000e+00> : vector<8x32xf32>
    %11 = tpu.matmul %9, %10, %cst_10 {dimension_numbers = #tpu.dot_dimension_numbers<[1], [0], [0], [1], [0, 0, 1, 1], [], []>} : vector<8x64xf32>, vector<64x32xf32>, vector<8x32xf32> -> vector<8x32xf32>
    %12 = vector.broadcast %2 : vector<1x32xf32> to vector<8x32xf32>
    %13 = arith.addf %11, %12 : vector<8x32xf32>
    %cst_11 = arith.constant 0.000000e+00 : f32
    %14 = vector.broadcast %cst_11 : f32 to vector<8x32xf32>
    %15 = arith.maximumf %13, %14 : vector<8x32xf32>
    %c0_12 = arith.constant 0 : index
    %c0_13 = arith.constant 0 : index
    %16 = vector.load %arg4[%c0_12, %c0_13] : memref<8x32xf32, #tpu.memory_space<vmem>>, vector<8x32xf32>
    %cst_14 = arith.constant dense<0.000000e+00> : vector<8x8xf32>
    %17 = tpu.matmul %16, %15, %cst_14 {dimension_numbers = #tpu.dot_dimension_numbers<[1], [1], [0], [0], [0, 0, 1, 0], [], []>} : vector<8x32xf32>, vector<8x32xf32>, vector<8x8xf32> -> vector<8x8xf32>
    %18 = vector.extract_strided_slice %17 {offsets = [0, 0], sizes = [1, 8], strides = [1, 1]} : vector<8x8xf32> to vector<1x8xf32>
    %19 = vector.broadcast %3 : vector<1x1xf32> to vector<1x8xf32>
    %20 = arith.addf %18, %19 : vector<1x8xf32>
    %cst_15 = arith.constant 0.000000e+00 : f32
    %21 = vector.broadcast %cst_15 : f32 to vector<1x8xf32>
    %22 = arith.subf %21, %20 : vector<1x8xf32>
    %23 = math.exp %22 : vector<1x8xf32>
    %cst_16 = arith.constant 1.000000e+00 : f32
    %24 = vector.broadcast %cst_16 : f32 to vector<1x8xf32>
    %25 = arith.addf %24, %23 : vector<1x8xf32>
    %26 = tpu.reciprocal %25 {approx = true} : vector<1x8xf32> -> vector<1x8xf32>
    %c0_17 = arith.constant 0 : index
    %c0_18 = arith.constant 0 : index
    %c0_19 = arith.constant 0 : index
    %27 = vector.load %arg6[%c0_17, %c0_18, %c0_19] : memref<1x1x8xf32, #tpu.memory_space<vmem>>, vector<1x1x8xf32>
    %28 = vector.shape_cast %27 : vector<1x1x8xf32> to vector<1x8xf32>
    %29 = vector.shape_cast %26 : vector<1x8xf32> to vector<1x1x8xf32>
    tpu.vector_store %arg6[%c0_17, %c0_18, %c0_19], %29 {strides = array<i32>} : memref<1x1x8xf32, #tpu.memory_space<vmem>>, vector<1x1x8xf32>,
    return
  }
  func.func @transform_0(%arg0: i32) -> (i32, i32) {
    %c0_i32 = arith.constant 0 : i32
    %c0_i32_0 = arith.constant 0 : i32
    return %arg0, %c0_i32 : i32, i32
  }
  func.func @transform_1(%arg0: i32) -> (i32, i32) {
    %c0_i32 = arith.constant 0 : i32
    %c0_i32_0 = arith.constant 0 : i32
    %c0_i32_1 = arith.constant 0 : i32
    return %c0_i32, %c0_i32_0 : i32, i32
  }
  func.func @transform_2(%arg0: i32) -> (i32, i32) {
    %c0_i32 = arith.constant 0 : i32
    %c0_i32_0 = arith.constant 0 : i32
    %c0_i32_1 = arith.constant 0 : i32
    return %c0_i32, %c0_i32_0 : i32, i32
  }
  func.func @transform_3(%arg0: i32) -> (i32, i32) {
    %c0_i32 = arith.constant 0 : i32
    %c0_i32_0 = arith.constant 0 : i32
    %c0_i32_1 = arith.constant 0 : i32
    return %c0_i32, %c0_i32_0 : i32, i32
  }
  func.func @transform_4(%arg0: i32) -> (i32, i32) {
    %c0_i32 = arith.constant 0 : i32
    %c0_i32_0 = arith.constant 0 : i32
    %c0_i32_1 = arith.constant 0 : i32
    return %c0_i32, %c0_i32_0 : i32, i32
  }
  func.func @transform_5(%arg0: i32) -> (i32, i32, i32) {
    %c0_i32 = arith.constant 0 : i32
    %c0_i32_0 = arith.constant 0 : i32
    %c0_i32_1 = arith.constant 0 : i32
    return %arg0, %c0_i32, %c0_i32_0 : i32, i32, i32
  }
}

</mosaic_0001>

<bundles_post_ra>
// kernel: tpu_custom_call.1
= control target key start
LH: loop header
LB: loop body
LE: loop exit
PB: predicated region body
PF: predicated region fallthrough
CT: control target
= control target key end

     0   :  { %10 = vsyncpa [#allocation3], 0  ;;  %s883_s0 = inlined_call_operand.vmem [shape: f32[24,8], index: 0, kind: input, shape index: {}]   ;;  %s884_s1 = inlined_call_operand.vmem [shape: f32[8,64], index: 1, kind: input, shape index: {}]   ;;  %s885_s2 = inlined_call_operand.vmem [shape: f32[64,32], index: 2, kind: input, shape index: {}]   ;;  %s886_s3 = inlined_call_operand.vmem [shape: f32[8,32], index: 3, kind: input, shape index: {}]   ;;  %s887_s4 = inlined_call_operand.vmem [shape: f32[3,128], index: 4, kind: input, shape index: {}]   ;;  %s888_s5 = inlined_call_operand.hbm [shape: f32[3,1,8], index: 5, kind: output, shape index: {}]  }
   0x1   :  { %12 = vsyncpa [#allocation3 + $0x1], 0  ;;  %s748_s18 = smov 0   ;;  %s750_s19 = smov 0  }
   0x2   :  { %s752_s20 = smov 0   ;;  %s754_s21 = smov 0  }
   0x3 LB: > { %s769_s22 = sadd.s32 4294967295, %s712_s21   ;;  %s549_s23 = sadd.s32 4294967294, %s712_s21   ;;  %s712_s21 = sphi %s754_s21, %s894_s21   ;;  %s708_s20 = sphi %s752_s20, %s893_s20   ;;  %s704_s19 = sphi %s750_s19, %s892_s19   ;;  %s700_s18 = sphi %s748_s18, %s891_s18  }
   0x4   : > { %s773_s24 = sadd.s32 1, %s712_s21   ;;  %s135_s25 = sadd.s32 1, %s708_s20 }
   0x5   : > { %s132_s26 = ssub.s32 %s712_s21, %s773_s24  ;;  %p145_p0 = scmp.ne.s32.totalorder %s708_s20, %s704_s19 }
   0x6   : > { %p133_p1 = scmp.eq.s32.totalorder %s132_s26, 0  ;;  %p146_p2 = scmp.eq.s32.totalorder %s769_s22, 2 }
   0x7   : > { %p151_p3 = scmp.ne.s32.totalorder %s704_s19, %s700_s18  ;;  %p152_p4 = scmp.eq.s32.totalorder %s549_s23, 2 }
   0x8   : > { %s784_s27 = scalar_select %p133_p1, %s708_s20, %s135_s25  }
   0x9   : > { %p786_p5 = por %p146_p2, %p145_p0  ;;  %p790_p6 = por %p152_p4, %p151_p3 }
   0xa   : > { %p552_p7 = scmp.ge.s32.totalorder %s712_s21, 1  ;;  %p189_p8 = scmp.lt.s32.totalorder %s712_s21, 4 }
   0xc   : > { %p190_p9 = pnand %p552_p7, %p189_p8 }
   0xd   : > { %p215_p10 = scmp.lt.s32.totalorder (!%p190_p9), %s769_s22, 2  ;;  %s213_s26 = sand.u32 (!%p190_p9), 1, %s704_s19  }
   0xe   : > { %193 = sbr.rel (%p190_p9) target bundleno = 663 (0x297), region = 40  ;;  %s560_s30 = sshll.u32 (!%p190_p9), %s769_s22, 4 }
   0xf   : > { %s214_s6 = scalar_lea.vmem (!%p190_p9), [#allocation2], %s213_s26  ;;  %s848_s10 = scalar_lea.hbm (!%p190_p9), %s888_s5, %s560_s30 }
  0x10   : > { %s494_s7 = sshll.u32 (!%p190_p9), %s214_s6, 4  ;;  %s482_s11 = scalar_lea.sflag (!%p190_p9), [#allocation3], %s213_s26  ;;  %s495_s7 = int_to_ptr.vmem [resolvable:$true] %s494_s7 }
  0x11   : > { %s717_s13 = smov (!%p190_p9), [#allocation2]  }
  0x12   : > { %s656_s14 = sshll.u32 (!%p190_p9), %s717_s13, 4  ;;  %s657_s14 = int_to_ptr.vmem [resolvable:$false] %s656_s14 }
  0x13   : > { %v223_v0 = vld [vmem:[%s884_s1] sm:$0xff]  ;;  %v310_v1 = vld [vmem:[%s885_s2 + $0x38] sm:$0xff]  ;;  %v714_v2 = vmov 0.0   ;;  %vm715_vm0 = vmmov 0   ;;  %s216_s9 = scalar_select %p215_p10, %s769_s22, 2  ;;  %v309_v3 = vld [vmem:[%s885_s2 + $0x30] sm:$0xff] }
  0x14   : > { %576 = vmatprep.subr.mxu0 %v714_v2  ;;  %578 = vmatprep.mubr.msk.f32.mxu0 %vm715_vm0, %v714_v2  ;;  %vm228_vm1 = vcmask 64512   ;;  %v308_v4 = vld [vmem:[%s885_s2 + $0x28] sm:$0xff]  ;;  %v307_v6 = vld [vmem:[%s885_s2 + $0x20] sm:$0xff]  ;;  %v306_v7 = vld [vmem:[%s885_s2 + $0x18] sm:$0xff]  ;;  %vm315_vm2 = vcmask 523264   ;;  %v716_v17 = vmov 0   ;;  %p659_p0 = scmp.lt.s32.totalorder %s495_s7, %s657_s14 }
  0x15   : > { %577 = vmatpush3.msra.mxu0 %v223_v0  ;;  %581 = vmatprep.subr.mxu1 %v714_v2  ;;  %s553_s12 = sshll.u32 %s216_s9, 3  ;;  %v305_v8 = vld [vmem:[%s885_s2 + $0x10] sm:$0xff]  ;;  %v304_v9 = vld [vmem:[%s885_s2 + $0x8] sm:$0xff]  ;;  %v303_v10 = vld [vmem:[%s885_s2] sm:$0xff]  ;;  %vm391_vm3 = vcmask 261120   ;;  %vm479_vm4 = vcmask 57344  }
  0x16   : > { %582 = vmatpush3.msra.mxu1 %v310_v1  ;;  %597 = vmatprep.mubr.msk.f32.mxu1 %vm715_vm0, %v714_v2  ;;  %s218_s17 = scalar_lea.vmem %s883_s0, %s553_s12  ;;  %v554_v11 = vld [vmem:[%s887_s4] ss:$0 sm:$0xff]  ;;  %v222_v16 = vld [vmem:[%s887_s4 + $0x2] sm:$0x1]  ;;  %v556_v18 = vld [vmem:[%s887_s4 + $0x1] ss:$0 sm:$0xff] }
  0x17   : > { %583 = vmatprep.subr.mxu1 %v714_v2  ;;  %600 = vmatprep.subr.mxu0 %v714_v2  ;;  %v219_v5 = vld [vmem:[%s218_s17] sm:$0xff]  ;;  %s652_s12 = scalar_lea.vmem %s495_s7, 16  ;;  %s658_s22 = scalar_lea.vmem %s657_s14, 32 }
  0x18   : > { %584 = vmatpush3.msra.mxu1 %v309_v3  ;;  %579 = vmatmul.mubr.msk.f32.vlgmr.msra.gmra.mxu0 %vm228_vm1, %v219_v5  ;;  %v390_v23 = vld [vmem:[%s886_s3] sm:$0xff]  ;;  %p653_p11 = scmp.ne.s32.totalorder %s495_s7, %s652_s12  ;;  %p660_p1 = scmp.lt.s32.totalorder %s658_s22, %s652_s12 }
  0x19   : > { %585 = vmatprep.subr.mxu1 %v714_v2  ;;  %602 = vmatprep.mubr.msk.f32.mxu0 %vm715_vm0, %v714_v2 }
  0x1a   : > { %586 = vmatpush3.msra.mxu1 %v308_v4  ;;  %647 = vset.pattern.permute.xlu0 %v716_v17  ;;  %p654_p12 = pnand %p653_p11, %p786_p5  ;;  %p661_p2 = por %p660_p1, %p659_p0 }
  0x1b   : > { %587 = vmatprep.subr.mxu1 %v714_v2  ;;  %470 = vperm.xlu0 %647, %v222_v16  }
  0x1c   : > { %588 = vmatpush3.msra.mxu1 %v307_v6  ;;  %p655_p13 = pneg %p654_p12 }
  0x1d   : > { %589 = vmatprep.subr.mxu1 %v714_v2 }
  0x1e   : > { %590 = vmatpush3.msra.mxu1 %v306_v7  ;;  %p662_p3 = pnand %p661_p2, %p655_p13 }
  0x1f   : > { %591 = vmatprep.subr.mxu1 %v714_v2 }
  0x20   : > { %592 = vmatpush3.msra.mxu1 %v305_v8 }
  0x21   : > { %593 = vmatprep.subr.mxu1 %v714_v2 }
  0x22   : > { %594 = vmatpush3.msra.mxu1 %v304_v9 }
  0x23   : > { %595 = vmatprep.subr.mxu1 %v714_v2 }
  0x24   : > { %596 = vmatpush3.msra.mxu1 %v303_v10 }
  0x96   : > { %v471_v24 = vpop.permute.xlu0 %470 }
  0xd8   : > { %v298_v12 = vpop.f32.mrf.mxu0 }
  0xd9   : > { %v299_v13 = vadd.f32 %v554_v11, %v298_v12 }
  0xda   : > { %v580_v14 = vpop.f32.mrf.mxu0 }
  0xdb   : > { %v302_v15 = vmax.f32 %v299_v13, 0.0 }
  0xdd   : > { %598 = vmatmul.mubr.msk.f32.vlgmr.msra.gmra.mxu1 %vm315_vm2, %v302_v15 }
 0x19d   : > { %v385_v19 = vpop.f32.mrf.mxu1 }
 0x19e   : > { %v386_v20 = vadd.f32 %v556_v18, %v385_v19 }
 0x19f   : > { %v599_v21 = vpop.f32.mrf.mxu1 }
 0x1a0   : > { %v389_v22 = vmax.f32 %v386_v20, 0.0 }
 0x1a2   : > { %601 = vmatpush3.xpose.msk.msra.mxu0 %vm391_vm3, %v389_v22 }
 0x1a5   : > { %603 = vmatmul.mubr.msk.f32.vlgmr.msra.gmra.mxu0 %vm391_vm3, %v390_v23 }
 0x265   : > { %v464_v25 = vpop.f32.mrf.mxu0 }
 0x266   : > { %v473_v26 = vadd.f32 %v471_v24, %v464_v25 }
 0x267   : > { %v604_v27 = vpop.f32.mrf.mxu0 }
 0x268   : > { %v474_v28 = vsub.f32 0.0, %v473_v26 }
 0x26a   : > { %v475_v29 = vmul.f32 1.442695, %v474_v28 }
 0x26c   : > { %648 = vpow2.f32 %v475_v29 }
 0x279   : > { %v649_v30 = vpop.eup %648 }
 0x27a   : > { %v477_v31 = vadd.f32 1.0, %v649_v30 }
 0x27c   : > { %650 = vrcp.f32 %v477_v31 }
 0x289   : > { %v651_v32 = vpop.eup %650 }
 0x28a   : > { %480 = vst.msk [vmem:[%s214_s6] sm:$0x1] %vm479_vm4, %v651_v32 }
 0x28b   : > { %665 = shalt.err (!%p662_p3)
}
 0x28c   : > { %s666_s15 = scalar_lea.hbm %s848_s10, 16  ;;  %s670_s23 = scalar_lea.hbm %s888_s5, 48 }
 0x28d   : > { %p667_p4 = scmp.ne.s32.totalorder %s848_s10, %s666_s15  ;;  %p671_p9 = scmp.lt.s32.totalorder %s848_s10, %s888_s5 }
 0x28e   : > { %p672_p10 = scmp.lt.s32.totalorder %s670_s23, %s666_s15 }
 0x28f   : > { %p668_p7 = pnand %p667_p4, %p786_p5 }
 0x290   : > { %p673_p11 = por %p672_p10, %p671_p9 }
 0x291   : > { %p669_p8 = pneg %p668_p7 }
 0x293   : > { %p674_p12 = pnand %p673_p11, %p669_p8 }
 0x295   : > { %677 = shalt.err (!%p674_p12)
}
 0x296   : > { %605 = dma.vmem_to_hbm [thread:$0]  (%p786_p5), %s495_s7, 16, %s848_s10, %s482_s11  }
 0x297 PF: > { %p611_p13 = scmp.ge.s32.totalorder %s712_s21, 2  ;;  %s506_s30 = sand.u32 1, %s700_s18  }
 0x298   : > { %s507_s6 = scalar_lea.sflag [#allocation3], %s506_s30 }
 0x299   : > { %p608_p0 = pnand %p611_p13, %p790_p6 }
 0x29b   : > { %p609_p1 = pneg %p608_p0 }
 0x29d   : > { %695 = dma.done.wait (%p609_p1), %s507_s6, 16  }
 0x29e   : > { %697 = vsyncadd (%p609_p1), %s507_s6, 4294967280  ;;  %p15_p2 = scmp.ge.s32.totalorder %s773_s24, 5   ;;  %s891_s18 = smov %s704_s19 }
 0x29f   : > { %s892_s19 = smov %s708_s20  ;;  %s893_s20 = smov %s784_s27 }
 0x2a0   : > { %s894_s21 = smov %s773_s24  ;;  %17 = sbr.rel (!%p15_p2) target bundleno = 3 (0x3), region = 75 }
 0x2a5   :  { %511 = vsyncpa [#allocation3], 1 }
 0x2a6   :  { %513 = vsyncpa [#allocation3 + $0x1], 1 }

</bundles_post_ra>
